<compile_context>
chip_gen: v7x
topology: tpu7x:2x2x1
jax: 0.10.0
libtpu: 0.0.40
codegen_flags: <defaults>
</compile_context>

<pallas_src>
import jax
import jax.numpy as jnp
from jax.experimental import pallas as pl
from jax.experimental.pallas import tpu as pltpu

_NEG_SLOPE = 0.01  # torch.nn.LeakyReLU() default negative_slope


def cmml_kernel(k_ref, sqk_ref, w1t_ref, b1_ref, w2t_ref, b2_ref, o_ref):
    gb, tq, o_dim = o_ref.shape
    d = k_ref.shape[2]

    k = k_ref[...]                                        # (gb, N, D) f32
    q_start = pl.multiple_of(pl.program_id(1) * tq, tq)
    q = k_ref[:, pl.ds(q_start, tq), :]                   # (gb, tq, D) f32

    # --- squared pairwise distances; factor 2 folded into the gram operand ---
    sq_q = jnp.sum(q * q, axis=-1, keepdims=True)         # (gb, tq, 1)
    sq_k = sqk_ref[...]                                    # (gb, 1, N) precomputed
    gram2 = jax.lax.dot_general(                           # 2 * q @ k^T, f32 (keeps
        q * 2.0, k, (((2,), (2,)), ((0,), (0,))),          # cancellation safe)
        preferred_element_type=jnp.float32)                # (gb, tq, N)
    neg_d2 = jnp.minimum(gram2 - sq_q - sq_k, 0.0)         # == -cdist(q,k)**2

    # --- soft adjacency + message passing (normalization & identity folded) ---
    e = jnp.exp(neg_d2)                                    # (gb, tq, N), in (0, 1]
    rowsum = jnp.sum(e, axis=-1, keepdims=True)            # >= 1 (self term)
    h_un = jax.lax.dot_general(                            # bf16 MXU, f32 accum
        e.astype(jnp.bfloat16), k.astype(jnp.bfloat16),
        (((2,), (1,)), ((0,), (0,))),
        preferred_element_type=jnp.float32)                # (gb, tq, D)
    h = h_un * pl.reciprocal(rowsum, approx=True) + q      # EUP vrcp, ~free

    # --- FFN_2layer (dropout = identity at inference); one big M dim per layer ---
    h2 = h.reshape(gb * tq, d).astype(jnp.bfloat16)
    h1 = jnp.dot(h2, w1t_ref[...],
                 preferred_element_type=jnp.float32) + b1_ref[...]   # (gb*tq, H)
    h1 = jnp.where(h1 > 0, h1, _NEG_SLOPE * h1)            # LeakyReLU(0.01)
    out = jnp.dot(h1.astype(jnp.bfloat16), w2t_ref[...],
                  preferred_element_type=jnp.float32) + b2_ref[...]  # (gb*tq, O)

    o_ref[...] = out.reshape(gb, tq, o_dim).astype(o_ref.dtype)


def _divisors(n):
    return [d for d in range(1, n + 1) if n % d == 0]


def _tq_candidates(n):
    # Query-row tiles that are multiples of 8 and divide N; else one full tile.
    cands = [t for t in (512, 256, 128, 64, 32, 16, 8) if t <= n and n % t == 0]
    return cands if cands else [n]


def _vmem_capacity_bytes():
    try:
        return int(pltpu.get_tpu_info().vmem_capacity_bytes)
    except Exception:
        return 64 << 20  # conservative default (v7x per-TensorCore VMEM)


def _select_tiles(B, N, D, H, O, capacity):
    """Pick (gb, tq) so pipeline buffers + f32 adjacency temporaries fit VMEM."""
    budget = int(capacity * 0.45)  # leave headroom for compiler-internal scratch

    def est(gb, tq):
        key = gb * N * D * 4                  # resident key block
        out = gb * tq * O * 4                 # output tile
        small = D * H * 2 + H * 4 + H * O * 2 + O * 4 + gb * N * 4
        adj = gb * tq * N * 4                 # gram / e / bf16 copies (x4 slack)
        vec = gb * tq * max(D, H, O) * 4      # h / h1 temporaries (x4 slack)
        return 2 * (key + out + small) + 4 * adj + 4 * vec

    best = None
    for gb in _divisors(B):
        for tq in _tq_candidates(N):
            if est(gb, tq) > budget:
                continue
            # Prefer >= 2 batch groups (v7x dual-TC shards batch without
            # duplicating the key block), then the largest grid step.
            score = ((B // gb >= 2) or B == 1, gb * tq, tq)
            if best is None or score > best[0]:
                best = (score, gb, tq)
    if best is None:
        return 1, min(_tq_candidates(N))      # smallest legal step; may spill
    return best[1], best[2]


def cmml_forward(r, w1, b1, w2, b2):
    B, N, D = r.shape
    H = w1.shape[0]
    O = w2.shape[0]

    r = r.astype(jnp.float32)
    # Canonical (K, N) MXU orientation for the FFN weights; bf16 halves DMA bytes.
    w1t = jnp.transpose(w1).astype(jnp.bfloat16)          # (D, H)
    w2t = jnp.transpose(w2).astype(jnp.bfloat16)          # (H, O)
    b1_2d = b1.reshape(1, H).astype(jnp.float32)
    b2_2d = b2.reshape(1, O).astype(jnp.float32)
    # Squared row norms computed once on the host side (tiny: B*N*4 bytes).
    sqk = jnp.sum(r * r, axis=-1)[:, None, :]             # (B, 1, N) f32

    capacity = _vmem_capacity_bytes()
    gb, tq = _select_tiles(B, N, D, H, O, capacity)
    grid = (B // gb, N // tq)

    # NOTE: the key block could be single-buffered (pl.Buffered(1)) since it
    # only changes once per N/tq steps; skipped here to keep lowering robust.
    out = pl.pallas_call(
        cmml_kernel,
        out_shape=jax.ShapeDtypeStruct((B, N, O), r.dtype),
        grid=grid,
        in_specs=[
            pl.BlockSpec((gb, N, D), lambda b, q: (b, 0, 0)),   # all rows (keys)
            pl.BlockSpec((gb, 1, N), lambda b, q: (b, 0, 0)),   # |k|^2, precomputed
            pl.BlockSpec((D, H), lambda b, q: (0, 0)),          # W1^T (bf16)
            pl.BlockSpec((1, H), lambda b, q: (0, 0)),          # b1
            pl.BlockSpec((H, O), lambda b, q: (0, 0)),          # W2^T (bf16)
            pl.BlockSpec((1, O), lambda b, q: (0, 0)),          # b2
        ],
        out_specs=pl.BlockSpec((gb, tq, O), lambda b, q: (b, q, 0)),
        compiler_params=pltpu.CompilerParams(
            dimension_semantics=("parallel", "arbitrary"),
            vmem_limit_bytes=int(capacity * 0.8),
        ),
    )(r, sqk, w1t, b1_2d, w2t, b2_2d)
    return out


def cmml_reference(r, w1, b1, w2, b2):
    # Pure-JAX f32 reference of the module's math (dropout = identity).
    gram = jnp.einsum("bnd,bmd->bnm", r, r)
    sq = jnp.sum(r * r, axis=-1, keepdims=True)
    d2 = jnp.maximum(sq + jnp.swapaxes(sq, 1, 2) - 2.0 * gram, 0.0)
    w = jnp.exp(-d2)
    w = w / jnp.sum(w, axis=-1, keepdims=True)
    w = w + jnp.eye(r.shape[1], dtype=r.dtype)[None]
    h = jnp.einsum("bnm,bmd->bnd", w, r)
    h1 = jnp.einsum("bnd,hd->bnh", h, w1) + b1
    h1 = jnp.where(h1 > 0, h1, _NEG_SLOPE * h1)
    return jnp.einsum("bnh,oh->bno", h1, w2) + b2


if __name__ == "__main__":
    # Small shapes consistent with the module: (batch, seq, in_features)
    B, N, D = 2, 8, 32
    H, O = 32, 16

    key = jax.random.PRNGKey(0)
    k_r, k_w1, k_b1, k_w2, k_b2 = jax.random.split(key, 5)

    r = jax.random.normal(k_r, (B, N, D), dtype=jnp.float32)
    # Deterministic parameter init (uniform, PyTorch-Linear-like scale).
    w1 = jax.random.uniform(k_w1, (H, D), jnp.float32, -1.0, 1.0) / jnp.sqrt(D)
    b1 = jax.random.uniform(k_b1, (H,), jnp.float32, -1.0, 1.0) / jnp.sqrt(D)
    w2 = jax.random.uniform(k_w2, (O, H), jnp.float32, -1.0, 1.0) / jnp.sqrt(H)
    b2 = jax.random.uniform(k_b2, (O,), jnp.float32, -1.0, 1.0) / jnp.sqrt(H)

    out = jax.block_until_ready(cmml_forward(r, w1, b1, w2, b2))
    ref = jax.block_until_ready(cmml_reference(r, w1, b1, w2, b2))

    assert out.shape == (B, N, O)
    # Tolerance accounts for the bf16 E@r / FFN matmuls (f32 accumulation) and
    # the EUP approx reciprocal used for row normalization.
    assert jnp.allclose(out, ref, rtol=2e-2, atol=2e-2), "mismatch vs reference"

    # TODO(synk): dropout is modelled as identity (inference mode only).
    print("KERNEL_OK")
</pallas_src>

<mosaic_0001>
module attributes {stable_mosaic.version = 11 : i64} {
  func.func @cmml_kernel(%arg0: i32, %arg1: i32, %arg2: memref<1x8x32xf32, #tpu.memory_space<vmem>>, %arg3: memref<1x1x8xf32, #tpu.memory_space<vmem>>, %arg4: memref<32x32xbf16, #tpu.memory_space<vmem>>, %arg5: memref<1x32xf32, #tpu.memory_space<vmem>>, %arg6: memref<32x16xbf16, #tpu.memory_space<vmem>>, %arg7: memref<1x16xf32, #tpu.memory_space<vmem>>, %arg8: memref<1x8x16xf32, #tpu.memory_space<vmem>>) attributes {dimension_semantics = [#tpu.dimension_semantics<parallel>, #tpu.dimension_semantics<arbitrary>], iteration_bounds = array<i64: 2, 1>, scalar_prefetch = 0 : i64, scratch_operands = 0 : i64, tpu.core_type = #tpu.core_type<tc>, window_params = [{transform_indices = @transform_0, window_bounds = array<i64: 1, 8, 32>}, {transform_indices = @transform_1, window_bounds = array<i64: 1, 1, 8>}, {pipeline_mode = #tpu.pipeline_mode<synchronous>, transform_indices = @transform_2, window_bounds = array<i64: 32, 32>}, {pipeline_mode = #tpu.pipeline_mode<synchronous>, transform_indices = @transform_3, window_bounds = array<i64: 1, 32>}, {pipeline_mode = #tpu.pipeline_mode<synchronous>, transform_indices = @transform_4, window_bounds = array<i64: 32, 16>}, {pipeline_mode = #tpu.pipeline_mode<synchronous>, transform_indices = @transform_5, window_bounds = array<i64: 1, 16>}, {transform_indices = @transform_6, window_bounds = array<i64: 1, 8, 16>}]} {
    %c0 = arith.constant 0 : index
    %c0_0 = arith.constant 0 : index
    %c0_1 = arith.constant 0 : index
    %0 = vector.load %arg2[%c0, %c0_0, %c0_1] : memref<1x8x32xf32, #tpu.memory_space<vmem>>, vector<1x8x32xf32>
    %c8_i32 = arith.constant 8 : i32
    %1 = arith.muli %arg1, %c8_i32 : i32
    %2 = tpu.assume_multiple %1, 8 : i32
    %c0_2 = arith.constant 0 : index
    %3 = arith.index_cast %2 : i32 to index
    %c0_3 = arith.constant 0 : index
    %4 = vector.load %arg2[%c0_2, %3, %c0_3] : memref<1x8x32xf32, #tpu.memory_space<vmem>>, vector<1x8x32xf32>
    %5 = arith.mulf %4, %4 : vector<1x8x32xf32>
    %cst = arith.constant dense<0.000000e+00> : vector<1x8xf32>
    %6 = vector.multi_reduction <add>, %5, %cst [2] : vector<1x8x32xf32> to vector<1x8xf32>
    %7 = vector.shape_cast %6 : vector<1x8xf32> to vector<1x8x1xf32>
    %c0_4 = arith.constant 0 : index
    %c0_5 = arith.constant 0 : index
    %c0_6 = arith.constant 0 : index
    %8 = vector.load %arg3[%c0_4, %c0_5, %c0_6] : memref<1x1x8xf32, #tpu.memory_space<vmem>>, vector<1x1x8xf32>
    %cst_7 = arith.constant 2.000000e+00 : f32
    %9 = vector.broadcast %cst_7 : f32 to vector<1x8x32xf32>
    %10 = arith.mulf %4, %9 : vector<1x8x32xf32>
    %cst_8 = arith.constant dense<0.000000e+00> : vector<1x8x8xf32>
    %11 = tpu.matmul %10, %0, %cst_8 {dimension_numbers = #tpu.dot_dimension_numbers<[2], [2], [1], [1], [0, 0, 0, 1, 1, 1], [0], [0]>} : vector<1x8x32xf32>, vector<1x8x32xf32>, vector<1x8x8xf32> -> vector<1x8x8xf32>
    %12 = vector.broadcast %7 : vector<1x8x1xf32> to vector<1x8x8xf32>
    %13 = arith.subf %11, %12 : vector<1x8x8xf32>
    %14 = vector.broadcast %8 : vector<1x1x8xf32> to vector<1x8x8xf32>
    %15 = arith.subf %13, %14 : vector<1x8x8xf32>
    %cst_9 = arith.constant 0.000000e+00 : f32
    %16 = vector.broadcast %cst_9 : f32 to vector<1x8x8xf32>
    %17 = arith.minimumf %15, %16 : vector<1x8x8xf32>
    %18 = math.exp %17 : vector<1x8x8xf32>
    %cst_10 = arith.constant dense<0.000000e+00> : vector<1x8xf32>
    %19 = vector.multi_reduction <add>, %18, %cst_10 [2] : vector<1x8x8xf32> to vector<1x8xf32>
    %20 = vector.shape_cast %19 : vector<1x8xf32> to vector<1x8x1xf32>
    %21 = arith.truncf %18 : vector<1x8x8xf32> to vector<1x8x8xbf16>
    %22 = arith.truncf %0 : vector<1x8x32xf32> to vector<1x8x32xbf16>
    %cst_11 = arith.constant dense<0.000000e+00> : vector<1x8x32xf32>
    %23 = tpu.matmul %21, %22, %cst_11 {dimension_numbers = #tpu.dot_dimension_numbers<[2], [1], [1], [2], [0, 0, 0, 1, 1, 2], [0], [0]>} : vector<1x8x8xbf16>, vector<1x8x32xbf16>, vector<1x8x32xf32> -> vector<1x8x32xf32>
    %24 = tpu.reciprocal %20 {approx = true} : vector<1x8x1xf32> -> vector<1x8x1xf32>
    %25 = vector.broadcast %24 : vector<1x8x1xf32> to vector<1x8x32xf32>
    %26 = arith.mulf %23, %25 : vector<1x8x32xf32>
    %27 = arith.addf %26, %4 : vector<1x8x32xf32>
    %28 = vector.shape_cast %27 : vector<1x8x32xf32> to vector<8x32xf32>
    %29 = arith.truncf %28 : vector<8x32xf32> to vector<8x32xbf16>
    %c0_12 = arith.constant 0 : index
    %c0_13 = arith.constant 0 : index
    %30 = vector.load %arg4[%c0_12, %c0_13] : memref<32x32xbf16, #tpu.memory_space<vmem>>, vector<32x32xbf16>
    %cst_14 = arith.constant dense<0.000000e+00> : vector<8x32xf32>
    %31 = tpu.matmul %29, %30, %cst_14 {dimension_numbers = #tpu.dot_dimension_numbers<[1], [0], [0], [1], [0, 0, 1, 1], [], []>} : vector<8x32xbf16>, vector<32x32xbf16>, vector<8x32xf32> -> vector<8x32xf32>
    %c0_15 = arith.constant 0 : index
    %c0_16 = arith.constant 0 : index
    %32 = vector.load %arg5[%c0_15, %c0_16] : memref<1x32xf32, #tpu.memory_space<vmem>>, vector<1x32xf32>
    %33 = vector.broadcast %32 : vector<1x32xf32> to vector<8x32xf32>
    %34 = arith.addf %31, %33 : vector<8x32xf32>
    %cst_17 = arith.constant 0.000000e+00 : f32
    %35 = vector.broadcast %cst_17 : f32 to vector<8x32xf32>
    %36 = arith.cmpf ogt, %34, %35 : vector<8x32xf32>
    %cst_18 = arith.constant 0.00999999977 : f32
    %37 = vector.broadcast %cst_18 : f32 to vector<8x32xf32>
    %38 = arith.mulf %37, %34 : vector<8x32xf32>
    %39 = arith.select %36, %34, %38 : vector<8x32xi1>, vector<8x32xf32>
    %40 = arith.truncf %39 : vector<8x32xf32> to vector<8x32xbf16>
    %c0_19 = arith.constant 0 : index
    %c0_20 = arith.constant 0 : index
    %41 = vector.load %arg6[%c0_19, %c0_20] : memref<32x16xbf16, #tpu.memory_space<vmem>>, vector<32x16xbf16>
    %cst_21 = arith.constant dense<0.000000e+00> : vector<8x16xf32>
    %42 = tpu.matmul %40, %41, %cst_21 {dimension_numbers = #tpu.dot_dimension_numbers<[1], [0], [0], [1], [0, 0, 1, 1], [], []>} : vector<8x32xbf16>, vector<32x16xbf16>, vector<8x16xf32> -> vector<8x16xf32>
    %c0_22 = arith.constant 0 : index
    %c0_23 = arith.constant 0 : index
    %43 = vector.load %arg7[%c0_22, %c0_23] : memref<1x16xf32, #tpu.memory_space<vmem>>, vector<1x16xf32>
    %44 = vector.broadcast %43 : vector<1x16xf32> to vector<8x16xf32>
    %45 = arith.addf %42, %44 : vector<8x16xf32>
    %46 = vector.shape_cast %45 : vector<8x16xf32> to vector<1x8x16xf32>
    %c0_24 = arith.constant 0 : index
    %c0_25 = arith.constant 0 : index
    %c0_26 = arith.constant 0 : index
    %47 = vector.load %arg8[%c0_24, %c0_25, %c0_26] : memref<1x8x16xf32, #tpu.memory_space<vmem>>, vector<1x8x16xf32>
    tpu.vector_store %arg8[%c0_24, %c0_25, %c0_26], %46 {strides = array<i32>} : memref<1x8x16xf32, #tpu.memory_space<vmem>>, vector<1x8x16xf32>,
    return
  }
  func.func @transform_0(%arg0: i32, %arg1: i32) -> (i32, i32, i32) {
    %c0_i32 = arith.constant 0 : i32
    %c0_i32_0 = arith.constant 0 : i32
    %c0_i32_1 = arith.constant 0 : i32
    return %arg0, %c0_i32, %c0_i32_0 : i32, i32, i32
  }
  func.func @transform_1(%arg0: i32, %arg1: i32) -> (i32, i32, i32) {
    %c0_i32 = arith.constant 0 : i32
    %c0_i32_0 = arith.constant 0 : i32
    %c0_i32_1 = arith.constant 0 : i32
    return %arg0, %c0_i32, %c0_i32_0 : i32, i32, i32
  }
  func.func @transform_2(%arg0: i32, %arg1: i32) -> (i32, i32) {
    %c0_i32 = arith.constant 0 : i32
    %c0_i32_0 = arith.constant 0 : i32
    %c0_i32_1 = arith.constant 0 : i32
    return %c0_i32, %c0_i32_0 : i32, i32
  }
  func.func @transform_3(%arg0: i32, %arg1: i32) -> (i32, i32) {
    %c0_i32 = arith.constant 0 : i32
    %c0_i32_0 = arith.constant 0 : i32
    %c0_i32_1 = arith.constant 0 : i32
    return %c0_i32, %c0_i32_0 : i32, i32
  }
  func.func @transform_4(%arg0: i32, %arg1: i32) -> (i32, i32) {
    %c0_i32 = arith.constant 0 : i32
    %c0_i32_0 = arith.constant 0 : i32
    %c0_i32_1 = arith.constant 0 : i32
    return %c0_i32, %c0_i32_0 : i32, i32
  }
  func.func @transform_5(%arg0: i32, %arg1: i32) -> (i32, i32) {
    %c0_i32 = arith.constant 0 : i32
    %c0_i32_0 = arith.constant 0 : i32
    %c0_i32_1 = arith.constant 0 : i32
    return %c0_i32, %c0_i32_0 : i32, i32
  }
  func.func @transform_6(%arg0: i32, %arg1: i32) -> (i32, i32, i32) {
    %c0_i32 = arith.constant 0 : i32
    %c0_i32_0 = arith.constant 0 : i32
    return %arg0, %arg1, %c0_i32 : i32, i32, i32
  }
}

</mosaic_0001>

<bundles_post_ra>
// kernel: tpu_custom_call.1
= control target key start
LH: loop header
LB: loop body
LE: loop exit
PB: predicated region body
PF: predicated region fallthrough
CT: control target
= control target key end

     0   :  { %11 = vsyncpa [#allocation3], 0  ;;  %s1157_s0 = inlined_call_operand.vmem [shape: f32[2,8,32], index: 0, kind: input, shape index: {}]   ;;  %s1158_s1 = inlined_call_operand.vmem [shape: f32[2,1,8], index: 1, kind: input, shape index: {}]   ;;  %s1159_s2 = inlined_call_operand.hbm [shape: bf16[32,32], index: 2, kind: input, shape index: {}]   ;;  %s1160_s3 = inlined_call_operand.vmem [shape: f32[1,32], index: 3, kind: input, shape index: {}]   ;;  %s1161_s4 = inlined_call_operand.vmem [shape: bf16[32,16], index: 4, kind: input, shape index: {}]   ;;  %s1162_s5 = inlined_call_operand.vmem [shape: f32[1,16], index: 5, kind: input, shape index: {}]   ;;  %s1163_s6 = inlined_call_operand.hbm [shape: f32[2,8,16], index: 6, kind: output, shape index: {}]  }
   0x1   :  { %12 = vsyncpa [#allocation4], 0 }
   0x2   :  { %14 = vsyncpa [#allocation4 + $0x1], 0  ;;  %s983_s21 = smov 0   ;;  %s985_s22 = smov 0  }
   0x3   :  { %s987_s23 = smov 0   ;;  %s989_s24 = smov 0  }
   0x4   :  { %s991_s25 = smov 0   ;;  %s993_s26 = smov 0  }
   0x5 LB: > { %s690_s27 = sadd.s32 4294967295, %s940_s26   ;;  %s691_s28 = sadd.s32 4294967294, %s940_s26   ;;  %s940_s26 = sphi %s993_s26, %s20_s26   ;;  %s936_s25 = sphi %s991_s25, %s1181_s25   ;;  %s932_s24 = sphi %s989_s24, %s1180_s24   ;;  %s928_s23 = sphi %s987_s23, %s1179_s23   ;;  %s924_s22 = sphi %s985_s22, %s1178_s22   ;;  %s920_s21 = sphi %s983_s21, %s1177_s21  }
   0x6   : > { %s32_s29 = sadd.s32 1, %s936_s25  ;;  %s177_s30 = sadd.s32 1, %s928_s23 }
   0x7   : > { %p34_p0 = scmp.ge.s32.totalorder %s32_s29, 2  ;;  %p187_p1 = scmp.ne.s32.totalorder %s928_s23, %s924_s22 }
   0x8   : > { %p188_p2 = scmp.eq.s32.totalorder %s690_s27, 1  ;;  %p193_p3 = scmp.ne.s32.totalorder %s924_s22, %s920_s21 }
   0x9   : > { %s1183_s29 = smov (%p34_p0, %s32_s29), 0  ;;  %p194_p5 = scmp.eq.s32.totalorder %s691_s28, 1 }
   0xa   : > { %p1023_p4 = por %p188_p2, %p187_p1  ;;  %s172_s8 = ssub.s32 %s936_s25, %s1183_s29 }
   0xb   : > { %p692_p6 = scmp.ge.s32.totalorder %s940_s26, 1  ;;  %p175_p7 = scmp.eq.s32.totalorder %s172_s8, 0 }
   0xc   : > { %s1168_s7 = scalar_select %p1023_p4, 1, 0 }
   0xd   : > { %p1030_p8 = por %p194_p5, %p193_p3  ;;  %p201_p9 = scmp.lt.s32.totalorder %s940_s26, 3 }
   0xe   : > { %s1036_s10 = scalar_select %p175_p7, %s928_s23, %s177_s30  }
   0xf   : > { %s1169_s9 = scalar_select %p1030_p8, 1, 0 }
  0x10   : > { %p1038_p10 = pnand %p692_p6, %p201_p9  ;;  %p1042_p11 = scmp.eq.s32.totalorder %s690_s27, 0 }
  0x11   : > { %s942_s13 = smov [#allocation2]   ;;  %s830_s18 = scalar_lea.hbm %s1159_s2, 256 }
  0x12   : > { %s1170_s11 = scalar_select %p1038_p10, 1, 0 }
  0x13   : > { %s1171_s12 = scalar_select %p1042_p11, 1, 0 }
  0x14   : > { %p758_p12 = pneg %p1038_p10  ;;  %s213_s14 = sshll.u32 %s942_s13, 4  ;;  %s214_s14 = int_to_ptr.vmem [resolvable:$true] %s213_s14 }
  0x15   : > { %p831_p0 = scmp.ne.s32.totalorder %s1159_s2, %s830_s18  ;;  %p837_p5 = scmp.lt.u32.totalorder %s830_s18, %s1159_s2 }
  0x16   : > { %p1050_p13 = pnand %p1042_p11, %p758_p12 }
  0x18   : > { %p832_p1 = pneg %p1050_p13 }
  0x1a   : > { %p833_p2 = pnand %p832_p1, %p831_p0 }
  0x1c   : > { %p834_p3 = pneg %p833_p2 }
  0x1e   : > { %p839_p6 = pnand %p837_p5, %p834_p3 }
  0x20   : > { %842 = shalt.err (!%p839_p6)
}
  0x21   : > { %s843_s30 = scalar_lea.vmem %s214_s14, 256  ;;  %p851_p8 = scmp.lt.s32.totalorder %s214_s14, %s214_s14 }
  0x22   : > { %p844_p7 = scmp.ne.s32.totalorder %s214_s14, %s843_s30  ;;  %p852_p4 = scmp.lt.s32.totalorder %s843_s30, %s843_s30 }
  0x24   : > { %p846_p9 = pnand %p844_p7, %p832_p1  ;;  %p853_p11 = por %p852_p4, %p851_p8 }
  0x26   : > { %p847_p12 = pneg %p846_p9 }
  0x28   : > { %p854_p10 = pnand %p853_p11, %p847_p12 }
  0x2a   : > { %857 = shalt.err (!%p854_p10)
}
  0x2b   : > { %s943_s8 = smov 64   ;;  %s944_s13 = smov 4  }
  0x2c   : > { %761 = dma.hbm_to_vmem [thread:$0]  (!%p1050_p13), %s1159_s2, 256, %s214_s14, [#allocation3], %s943_s8, %s943_s8, %s944_s13  }
  0x2d   : > { %p1173_p0 = scmp.ne.s32.totalorder %s1170_s11, 0 }
  0x2e   : > { %p1174_p2 = scmp.ne.s32.totalorder (!%p1173_p0), %s1171_s12, 0 }
  0x2f   : > { %251 = sbr.rel (%p1173_p0) target bundleno = 963 (0x3c3), region = 44 }
  0x36   : > { %911 = dma.done.wait (%p1174_p2), [#allocation3], 256  }
  0x37   : > { %913 = vsyncadd (%p1174_p2), [#allocation3], 4294967040  ;;  %p283_p4 = scmp.lt.s32.totalorder %s932_s24, 1  ;;  %v945_v0 = vmov 0.0   ;;  %vm946_vm0 = vmmov 0   ;;  %vm296_vm1 = vcmask 261120  }
  0x38   : > { %725 = vmatprep.subr.mxu0 %v945_v0  ;;  %727 = vmatprep.mubr.msk.f32.mxu0 %vm946_vm0, %v945_v0  ;;  %vm398_vm2 = vcmask 1043456   ;;  %vm389_vm3 = vcmask 64512   ;;  %v822_v18 = vld [vmem:[#allocation2] sm:$0xff]   ;;  %v823_v19 = vld [vmem:[#allocation2 + $0x8] sm:$0xff]   ;;  %vm582_vm5 = vcmask 130048   ;;  %p1175_p10 = scmp.ne.s32.totalorder %s1168_s7, 0 }
  0x39   : > { %s284_s15 = scalar_select %p283_p4, %s932_s24, 1  ;;  %730 = vmatprep.subr.bf16.mxu1 %v945_v0  ;;  %732 = vmatprep.mubr.msk.bf16.mxu1 %vm946_vm0, %v945_v0  ;;  %v824_v29 = vld [vmem:[%s1161_s4] sm:$0xff]   ;;  %v825_v30 = vld [vmem:[%s1161_s4 + $0x8] sm:$0xff]  }
  0x3a   : > { %v703_v31 = vld [vmem:[%s1160_s3] ss:$0 sm:$0xff]  ;;  %s947_s13 = smov [#allocation5]  }
  0x3b   : > { %s698_s11 = sshll.u32 %s284_s15, 3  ;;  %s289_s27 = scalar_lea.vmem %s1158_s1, %s284_s15  ;;  %v707_v40 = vld [vmem:[%s1162_s5] ss:$0 sm:$0xff] }
  0x3c   : > { %s286_s19 = scalar_lea.vmem %s1157_s0, %s698_s11  ;;  %v701_v8 = vld [vmem:[%s289_s27] ss:$0 sm:$0xff]  ;;  %s280_s15 = sand.u32 1, %s924_s22  }
  0x3d   : > { %v291_v1 = vld [vmem:[%s286_s19] sm:$0xff]  ;;  %s697_s11 = sshll.u32 %s280_s15, 3  ;;  %s712_s19 = sshll.u32 %s932_s24, 7 }
  0x3e   : > { %v301_v2 = vmul.f32 2.0, %v291_v1  ;;  %726 = vmatpush3.xpose.msk.msra.mxu0 %vm296_vm1, %v291_v1  ;;  %v295_v3 = vmul.f32 %v291_v1, %v291_v1  ;;  %v394_v5 = vpack.c.bf16 %v291_v1, %v291_v1  ;;  %s282_s12 = scalar_lea.vmem [#allocation5], %s697_s11  ;;  %s1110_s30 = scalar_lea.hbm %s1163_s6, %s712_s19 }
  0x3f   : > { %736 = vmatprep.subr.bf16.mxu0 %v945_v0  ;;  %s599_s20 = sshll.u32 %s282_s12, 4  ;;  %s585_s24 = scalar_lea.sflag [#allocation4], %s280_s15  ;;  %s1112_s20 = int_to_ptr.vmem [resolvable:$true] %s599_s20 }
  0x40   : > { %v297_v4 = vsel %vm296_vm1, %v295_v3, 0.0  ;;  %v400_v6 = vsel %vm398_vm2, %v394_v5, 0  ;;  %s858_s8 = scalar_lea.vmem %s1112_s20, 128  ;;  %s862_s16 = sshll.u32 %s947_s13, 4  ;;  %s863_s16 = int_to_ptr.vmem [resolvable:$false] %s862_s16 }
  0x41   : > { %728 = vmatmul.mubr.msk.f32.vlgmr.msra.gmra.mrb[0].mxu0 %vm296_vm1, %v301_v2  ;;  %298 = vadd.xlane.f32.xlu0 %v297_v4  ;;  %p859_p8 = scmp.ne.s32.totalorder %s1112_s20, %s858_s8  ;;  %s864_s17 = scalar_lea.vmem %s863_s16, 256 }
  0x42   : > { %740 = vmatprep.mubr.msk.bf16.mxu0 %vm946_vm0, %v945_v0  ;;  %731 = vmatpush3.bf16.msra.mxu1 %v400_v6  ;;  %p865_p1 = scmp.lt.s32.totalorder %s1112_s20, %s863_s16  ;;  %p866_p3 = scmp.lt.s32.totalorder %s864_s17, %s858_s8 }
  0x43   : > { %744 = vmatprep.subr.bf16.mxu1 %v945_v0  ;;  %737 = vmatpush3.bf16.msra.mxu0 %v822_v18  ;;  %p860_p11 = pnand %p859_p8, %p1175_p10 }
  0x44   : > { %738 = vmatprep.subr.bf16.mxu0 %v945_v0  ;;  %p867_p5 = por %p866_p3, %p865_p1 }
  0x45   : > { %p861_p13 = pneg %p860_p11 }
  0x47   : > { %739 = vmatpush3.bf16.msra.mxu0 %v823_v19  ;;  %p868_p6 = pnand %p867_p5, %p861_p13 }
  0xce   : > { %v299_v7 = vpop.xlane.xlu0 %298 }
 0x114   : > { %v374_v9 = vpop.f32.mrb[0].mxu0 }
 0x115   : > { %v378_v10 = vsub.f32 %v374_v9, %v299_v7  ;;  %v729_v11 = vpop.f32.mrb[1].mxu0 }
 0x117   : > { %v385_v12 = vsub.f32 %v378_v10, %v701_v8 }
 0x119   : > { %v386_v13 = vmin.f32 %v385_v12, 0.0 }
 0x11b   : > { %v387_v14 = vmul.f32 1.442695, %v386_v13 }
 0x11d   : > { %826 = vpow2.f32 %v387_v14 }
 0x127   : > { %v827_v15 = vpop.eup %826 }
 0x128   : > { %v390_v16 = vsel %vm389_vm3, %v827_v15, 0.0  ;;  %v393_v17 = vpack.c.bf16 %v827_v15, %v827_v15 }
 0x129   : > { %391 = vadd.xlane.f32.xlu0 %v390_v16 }
 0x12a   : > { %733 = vmatmul.mubr.msk.bf16.vlgmr.msra.gmra.mrb[0].mxu1 %vm389_vm3, %v393_v17 }
 0x12b   : > { %748 = vmatprep.mubr.msk.bf16.mxu1 %vm946_vm0, %v945_v0  ;;  %745 = vmatpush3.bf16.msra.mxu1 %v824_v29 }
 0x12c   : > { %746 = vmatprep.subr.bf16.mxu1 %v945_v0 }
 0x12f   : > { %747 = vmatpush3.bf16.msra.mxu1 %v825_v30 }
 0x1b6   : > { %v392_v20 = vpop.xlane.xlu0 %391 }
 0x1b7   : > { %828 = vrcp.f32 %v392_v20 }
 0x1c1   : > { %v829_v21 = vpop.eup %828 }
 0x1fd   : > { %v436_v22 = vpop.f32.mrb[0].mxu1 }
 0x1fe   : > { %v443_v23 = vmul.f32 %v829_v21, %v436_v22  ;;  %v734_v24 = vpop.f32.mrb[1].mxu1 }
 0x1ff   : > { %v439_v25 = vpop.f32.mrb[2].mxu1 }
 0x200   : > { %v444_v26 = vadd.f32 %v443_v23, %v291_v1  ;;  %v735_v27 = vpop.f32.mrb[3].mxu1 }
 0x202   : > { %v445_v28 = vpack.c.bf16 %v444_v26, %v444_v26 }
 0x204   : > { %741 = vmatmul.mubr.msk.bf16.vlgmr.msra.gmra.mrb[4].mxu0 %vm296_vm1, %v445_v28 }
 0x2d7   : > { %v506_v32 = vpop.f32.mrb[4].mxu0 }
 0x2d8   : > { %v507_v33 = vadd.f32 %v703_v31, %v506_v32  ;;  %v742_v34 = vpop.f32.mrb[5].mxu0 }
 0x2d9   : > { %v509_v35 = vpop.f32.mrb[6].mxu0 }
 0x2da   : > { %vm512_vm4 = vcmp.gt.f32.partialorder %v507_v33, 0.0  ;;  %v513_v36 = vmul.f32 0.01, %v507_v33  ;;  %v743_v37 = vpop.f32.mrb[7].mxu0 }
 0x2dc   : > { %v514_v38 = vsel %vm512_vm4, %v507_v33, %v513_v36 }
 0x2dd   : > { %v515_v39 = vpack.c.bf16 %v514_v38, %v514_v38 }
 0x2df   : > { %749 = vmatmul.mubr.msk.bf16.vlgmr.msra.gmra.mrb[4].mxu1 %vm296_vm1, %v515_v39 }
 0x3b2   : > { %v576_v41 = vpop.f32.mrb[4].mxu1 }
 0x3b3   : > { %v577_v42 = vadd.f32 %v707_v40, %v576_v41  ;;  %v750_v43 = vpop.f32.mrb[5].mxu1 }
 0x3b4   : > { %v579_v44 = vpop.f32.mrb[6].mxu1 }
 0x3b5   : > { %v751_v45 = vpop.f32.mrb[7].mxu1  ;;  %583 = vst.msk [vmem:[%s282_s12] sm:$0xff] %vm582_vm5, %v577_v42 }
 0x3b6   : > { %871 = shalt.err (!%p868_p6)
}
 0x3b7   : > { %s872_s15 = scalar_lea.hbm %s1110_s30, 128  ;;  %s876_s18 = scalar_lea.hbm %s1163_s6, 256 }
 0x3b8   : > { %p873_p7 = scmp.ne.s32.totalorder %s1110_s30, %s872_s15  ;;  %p877_p0 = scmp.lt.u32.totalorder %s1110_s30, %s1163_s6 }
 0x3b9   : > { %p878_p2 = scmp.lt.u32.totalorder %s876_s18, %s872_s15  ;;  %p880_p8 = scmp.lt.u32.totalorder %s872_s15, %s1110_s30 }
 0x3ba   : > { %p874_p9 = pnand %p873_p7, %p1175_p10 }
 0x3bb   : > { %p879_p4 = por %p878_p2, %p877_p0 }
 0x3bc   : > { %p875_p12 = pneg %p874_p9 }
 0x3bd   : > { %p881_p11 = por %p880_p8, %p879_p4 }
 0x3bf   : > { %p882_p13 = pnand %p881_p11, %p875_p12 }
 0x3c1   : > { %885 = shalt.err (!%p882_p13)
}
 0x3c2   : > { %756 = dma.vmem_to_hbm [thread:$0]  (%p1175_p10), %s1112_s20, 128, %s1110_s30, %s585_s24  }
 0x3c3 PF: > { %p768_p1 = scmp.ge.s32.totalorder %s940_s26, 2  ;;  %s611_s27 = sand.u32 1, %s920_s21  }
 0x3c4   : > { %p1176_p3 = scmp.ne.s32.totalorder %s1169_s9, 0  ;;  %s612_s28 = scalar_lea.sflag [#allocation4], %s611_s27 }
 0x3c6   : > { %p763_p5 = pnand %p768_p1, %p1176_p3 }
 0x3c8   : > { %915 = dma.done.wait (!%p763_p5), %s612_s28, 128  }
 0x3c9   : > { %917 = vsyncadd (!%p763_p5), %s612_s28, 4294967168  ;;  %s20_s26 = sadd.s32 1, %s940_s26   ;;  %s1177_s21 = smov %s924_s22 }
 0x3ca   : > { %p17_p6 = scmp.ge.s32.totalorder %s20_s26, 4   ;;  %s1178_s22 = smov %s928_s23 }
 0x3cb   : > { %s1179_s23 = smov %s1036_s10  ;;  %s1180_s24 = smov %s936_s25 }
 0x3cc   : > { %s1181_s25 = smov %s1183_s29  ;;  %19 = sbr.rel (!%p17_p6) target bundleno = 5 (0x5), region = 88 }
 0x3d3   :  { %617 = vsyncpa [#allocation3], 1 }
 0x3d4   :  { %619 = vsyncpa [#allocation3 + $0x1], 1 }
 0x3d5   :  { %620 = vsyncpa [#allocation4], 1 }
 0x3d6   :  { %622 = vsyncpa [#allocation4 + $0x1], 1 }

</bundles_post_ra>
